<compile_context>
chip_gen: v7x
topology: tpu7x:2x2x1
jax: 0.10.0
libtpu: 0.0.40
codegen_flags: <defaults>
</compile_context>

<pallas_src>
import functools

import jax
import jax.numpy as jnp
from jax import lax
from jax.experimental import pallas as pl
from jax.experimental.pallas import tpu as pltpu


def _vq_kernel(x_ref, w_ref, q_ref, idx_ref, sse_ref, *, chunk, n_chunks):
    """One (batch row, token super-tile) grid step.

    x_ref:   [D, ST]   inputs, tokens lane-dense (ST = n_chunks * chunk)
    w_ref:   [E, D]    codebook
    q_ref:   [D, ST]   fused straight-through outputs  x + (q - x)
    idx_ref: [1, ST]   int32 argmin codebook indices
    sse_ref: [8, 128]  per-step sum((q - x)^2), broadcast to one full vreg
    """
    w = w_ref[...]                                             # [E, D]
    e_num, d_dim = w.shape

    # Hoisted once per grid step (reused by every chunk AND by both the
    # cross-term and the q row select-sum): codebook columns lane-broadcast to
    # the chunk width, squared codebook norms, and the row-index iota.
    # At chunk=256, E=16, D=4 this is ~24 resident vregs.
    w2_b = jnp.broadcast_to(jnp.sum(w * w, axis=1, keepdims=True),
                            (e_num, chunk))                    # [E, chunk]
    w_cols = [jnp.broadcast_to(w[:, dd:dd + 1], (e_num, chunk))
              for dd in range(d_dim)]                          # D x [E, chunk]
    row = lax.broadcasted_iota(jnp.int32, (e_num, chunk), 0)   # [E, chunk]

    def chunk_body(c, sse_acc):
        start = c * chunk
        if not isinstance(start, int):
            start = pl.multiple_of(start, chunk)
        x = x_ref[:, pl.ds(start, chunk)]                      # [D, chunk]

        # dist[e, n] = ||w_e||^2 - 2 <w_e, x_n>  (||x_n||^2 is constant per
        # token and dropped).  Cross term on the VPU, unrolled over the tiny D
        # axis: a K=4 matmul would leave the MXU nearly idle (f32 multi-pass).
        cross = w_cols[0] * x[0:1, :]
        for dd in range(1, d_dim):
            cross = cross + w_cols[dd] * x[dd:dd + 1, :]
        dist = w2_b - 2.0 * cross                              # [E, chunk]

        # argmin over E with first-occurrence tie-break (min of masked iota).
        min_d = jnp.min(dist, axis=0, keepdims=True)           # [1, chunk]
        idx = jnp.min(jnp.where(dist == min_d, row, e_num),
                      axis=0, keepdims=True)                   # [1, chunk] i32
        idx_ref[:, pl.ds(start, chunk)] = idx
        # TODO(synk): pack 2-4 indices per 32-bit lane (pltpu.bitcast) to shrink
        # the index writeback further.

        enc = (row == idx).astype(jnp.float32)                 # [E, chunk]

        # Exact codebook row-select (masked select-sum), fused straight-through
        # add, and lane-wise SSE accumulation (VPU only, no per-chunk XLU
        # reduce).  Rows written in place: no sublane concat before the store.
        for dd in range(d_dim):
            x_row = x[dd:dd + 1, :]                            # [1, chunk]
            q_row = jnp.sum(enc * w_cols[dd], axis=0, keepdims=True)
            diff = q_row - x_row
            q_ref[dd:dd + 1, pl.ds(start, chunk)] = x_row + diff
            sse_acc = sse_acc + diff * diff                    # [1, chunk]
        return sse_acc

    sse_init = jnp.zeros((1, chunk), jnp.float32)
    if n_chunks <= 8:
        # Short static trip-count: plain unroll keeps the LLO scheduler happy.
        sse_acc = sse_init
        for c in range(n_chunks):
            sse_acc = chunk_body(c, sse_acc)
    else:
        sse_acc = lax.fori_loop(0, n_chunks, chunk_body, sse_init)

    # One cross-lane reduction per grid step (not per chunk); the store stays a
    # single full, lane-dense vreg (unmasked vst).
    sse_ref[...] = jnp.zeros_like(sse_ref) + jnp.sum(sse_acc)


def _pick_grid(b, hw):
    """grid = (B, NS), both axes 'parallel'.  Split the token range in two when
    B == 1 so both v7x TensorCores are fed (no-op on v5e/v6e)."""
    if b >= 2 or hw % 256 != 0:
        ns = 1
    else:
        ns = 2
    return ns, hw // ns


def _pick_chunk(st):
    """Inner lane chunk: multiple of 128 dividing the super-tile.  256 keeps the
    hoisted [E, chunk] codebook broadcasts + dist/enc temporaries ~45 live
    vregs at E=16, comfortably under the 64-vreg file (no spills)."""
    for cand in (256, 128):
        if st % cand == 0:
            return cand
    # TODO(synk): pad HW to a multiple of 128 in the wrapper instead of taking
    # masked partial stores on this fallback (matters most on v5e).
    return st


def vector_quantizer_ema_forward(x_nchw, embedding_w, commitment_cost=0.25):
    """Forward pass of VectorQuantizerEMA (inference semantics).

    Args:
      x_nchw:      [B, C, H, W] float inputs (C == embedding_dim).
      embedding_w: [E, C] float codebook (nn.Embedding weight).

    Returns:
      (loss, quantized_nchw, perplexity, encodings) matching the torch module.
    """
    b, c, h, w = x_nchw.shape
    e, d = embedding_w.shape
    assert d == c, "channel dim must equal embedding_dim"

    hw = h * w
    ns, st = _pick_grid(b, hw)
    chunk = _pick_chunk(st)
    n_chunks = st // chunk
    assert n_chunks * chunk == st

    # Work natively on NCHW viewed as [B, D, HW]: the big token axis sits on
    # lanes (lane-dense loads/stores), and no NCHW<->NHWC transposes are needed.
    x3 = x_nchw.reshape(b, c, hw).astype(jnp.float32)          # [B, D, HW]
    wgt = embedding_w.astype(jnp.float32)                      # [E, D]

    kernel = functools.partial(_vq_kernel, chunk=chunk, n_chunks=n_chunks)

    n_tok = b * hw
    cost = pl.CostEstimate(
        flops=3 * e * c * n_tok,                               # dist + select
        transcendentals=0,
        bytes_accessed=(2 * c * 4 + 4) * n_tok + b * ns * e * c * 4,
    )

    # Per-step VMEM: ~2 buffers x 36 B/token x ST  (<5 MB even at ST=64K), so
    # the 32 MiB scoped limit is safe on every generation incl. v7x.
    q3, idx3, sse = pl.pallas_call(
        kernel,
        grid=(b, ns),
        in_specs=[
            pl.BlockSpec((None, c, st), lambda i, j: (i, 0, j)),   # x tile
            pl.BlockSpec((e, d), lambda i, j: (0, 0)),             # codebook
        ],
        out_specs=[
            pl.BlockSpec((None, c, st), lambda i, j: (i, 0, j)),   # quantized (STE)
            pl.BlockSpec((None, 1, st), lambda i, j: (i, 0, j)),   # indices
            pl.BlockSpec((None, None, 8, 128), lambda i, j: (i, j, 0, 0)),  # SSE
        ],
        out_shape=(
            jax.ShapeDtypeStruct((b, c, hw), jnp.float32),
            jax.ShapeDtypeStruct((b, 1, hw), jnp.int32),
            jax.ShapeDtypeStruct((b, ns, 8, 128), jnp.float32),
        ),
        compiler_params=pltpu.CompilerParams(
            dimension_semantics=("parallel", "parallel"),
            vmem_limit_bytes=32 * 1024 * 1024,
        ),
        cost_estimate=cost,
    )(x3, wgt)

    # commitment loss: commitment_cost * mean((quantized_raw - inputs)^2)
    e_latent_loss = jnp.sum(sse[:, :, 0, 0]) / jnp.float32(b * c * hw)
    loss = commitment_cost * e_latent_loss

    # Straight-through output already fused in the kernel (x + (q - x)).
    # TODO(synk): pallas_call is not differentiable; training-mode gradients
    # (straight-through / commitment) need a custom_vjp.
    quantized = q3.reshape(b, c, h, w)

    # Perplexity from a bincount of the indices (no dependence on the dense
    # one-hot); row order is (b, h, w)-major, identical to torch's
    # permute(0,2,3,1).view(-1, C).
    idx_flat = idx3.reshape(-1)
    counts = jnp.bincount(idx_flat, length=e).astype(jnp.float32)
    avg_probs = counts / jnp.float32(idx_flat.shape[0])
    perplexity = jnp.exp(-jnp.sum(avg_probs * jnp.log(avg_probs + 1e-10)))

    # The [N, E] one-hot is only materialized because the torch module returns
    # it; if a caller drops it, XLA DCE removes this entirely.
    encodings = jax.nn.one_hot(idx_flat, e, dtype=jnp.float32)

    # TODO(synk): training-mode EMA buffer updates (_ema_cluster_size, _ema_w,
    # codebook refresh) are stateful and do not affect forward outputs; omitted.
    return loss, quantized, perplexity, encodings


if __name__ == "__main__":
    # Module config: num_embeddings=16, embedding_dim=4, commitment_cost=0.25
    num_embeddings = 16
    embedding_dim = 4
    commitment_cost = 0.25

    key = jax.random.PRNGKey(0)
    k_x, k_w = jax.random.split(key)

    # PyTorch conv inputs are NCHW; C == embedding_dim.
    x = jax.random.normal(k_x, (2, embedding_dim, 16, 16), dtype=jnp.float32)
    embedding_w = jax.random.normal(
        k_w, (num_embeddings, embedding_dim), dtype=jnp.float32)

    loss, quantized, perplexity, encodings = jax.block_until_ready(
        vector_quantizer_ema_forward(x, embedding_w, commitment_cost))

    # Shape checks.
    assert quantized.shape == x.shape
    assert encodings.shape == (2 * 16 * 16, num_embeddings)
    assert loss.shape == () and perplexity.shape == ()

    # Self-consistency checks (use the kernel's own indices, so they are
    # insensitive to argmin tie-breaking / distance rounding differences).
    n_tok = 2 * 16 * 16
    idx = jnp.argmax(encodings, axis=-1)                          # [N]
    x_tok = x.reshape(2, embedding_dim, -1).transpose(0, 2, 1).reshape(
        n_tok, embedding_dim)
    q_tok = embedding_w[idx]                                      # [N, D]
    ste_ref = x_tok + (q_tok - x_tok)
    got_tok = quantized.reshape(2, embedding_dim, -1).transpose(0, 2, 1).reshape(
        n_tok, embedding_dim)
    assert jnp.allclose(got_tok, ste_ref, atol=1e-6), "STE output mismatch"
    loss_ref = commitment_cost * jnp.mean((q_tok - x_tok) ** 2)
    assert jnp.allclose(loss, loss_ref, rtol=1e-4, atol=1e-7), "loss mismatch"

    print("KERNEL_OK")
</pallas_src>

<mosaic_0001>
module attributes {stable_mosaic.version = 11 : i64} {
  func.func @_vq_kernel(%arg0: i32, %arg1: i32, %arg2: memref<1x4x256xf32, #tpu.memory_space<vmem>>, %arg3: memref<16x4xf32, #tpu.memory_space<vmem>>, %arg4: memref<1x4x256xf32, #tpu.memory_space<vmem>>, %arg5: memref<1x1x256xi32, #tpu.memory_space<vmem>>, %arg6: memref<1x1x8x128xf32, #tpu.memory_space<vmem>>) attributes {dimension_semantics = [#tpu.dimension_semantics<parallel>, #tpu.dimension_semantics<parallel>], iteration_bounds = array<i64: 2, 1>, scalar_prefetch = 0 : i64, scratch_operands = 0 : i64, tpu.core_type = #tpu.core_type<tc>, window_params = [{transform_indices = @transform_0, window_bounds = array<i64: 1, 4, 256>}, {pipeline_mode = #tpu.pipeline_mode<synchronous>, transform_indices = @transform_1, window_bounds = array<i64: 16, 4>}, {transform_indices = @transform_2, window_bounds = array<i64: 1, 4, 256>}, {transform_indices = @transform_3, window_bounds = array<i64: 1, 1, 256>}, {transform_indices = @transform_4, window_bounds = array<i64: 1, 1, 8, 128>}]} {
    %c0 = arith.constant 0 : index
    %c0_0 = arith.constant 0 : index
    %0 = vector.load %arg3[%c0, %c0_0] : memref<16x4xf32, #tpu.memory_space<vmem>>, vector<16x4xf32>
    %1 = arith.mulf %0, %0 : vector<16x4xf32>
    %cst = arith.constant dense<0.000000e+00> : vector<16xf32>
    %2 = vector.multi_reduction <add>, %1, %cst [1] : vector<16x4xf32> to vector<16xf32>
    %3 = vector.shape_cast %2 : vector<16xf32> to vector<16x1xf32>
    %4 = vector.shape_cast %3 : vector<16x1xf32> to vector<16x1xf32>
    %5 = vector.broadcast %4 : vector<16x1xf32> to vector<16x256xf32>
    %6 = vector.extract_strided_slice %0 {offsets = [0, 0], sizes = [16, 1], strides = [1, 1]} : vector<16x4xf32> to vector<16x1xf32>
    %7 = vector.shape_cast %6 : vector<16x1xf32> to vector<16x1xf32>
    %8 = vector.broadcast %7 : vector<16x1xf32> to vector<16x256xf32>
    %9 = vector.extract_strided_slice %0 {offsets = [0, 1], sizes = [16, 1], strides = [1, 1]} : vector<16x4xf32> to vector<16x1xf32>
    %10 = vector.shape_cast %9 : vector<16x1xf32> to vector<16x1xf32>
    %11 = vector.broadcast %10 : vector<16x1xf32> to vector<16x256xf32>
    %12 = vector.extract_strided_slice %0 {offsets = [0, 2], sizes = [16, 1], strides = [1, 1]} : vector<16x4xf32> to vector<16x1xf32>
    %13 = vector.shape_cast %12 : vector<16x1xf32> to vector<16x1xf32>
    %14 = vector.broadcast %13 : vector<16x1xf32> to vector<16x256xf32>
    %15 = vector.extract_strided_slice %0 {offsets = [0, 3], sizes = [16, 1], strides = [1, 1]} : vector<16x4xf32> to vector<16x1xf32>
    %16 = vector.shape_cast %15 : vector<16x1xf32> to vector<16x1xf32>
    %17 = vector.broadcast %16 : vector<16x1xf32> to vector<16x256xf32>
    %18 = tpu.iota {dimensions = array<i32: 0>} : vector<16x256xi32>
    %cst_1 = arith.constant 0.000000e+00 : f32
    %19 = vector.broadcast %cst_1 : f32 to vector<1x256xf32>
    %c0_2 = arith.constant 0 : index
    %c0_3 = arith.constant 0 : index
    %c0_4 = arith.constant 0 : index
    %20 = vector.load %arg2[%c0_2, %c0_3, %c0_4] : memref<1x4x256xf32, #tpu.memory_space<vmem>>, vector<1x4x256xf32>
    %21 = vector.shape_cast %20 : vector<1x4x256xf32> to vector<4x256xf32>
    %22 = vector.extract_strided_slice %21 {offsets = [0, 0], sizes = [1, 256], strides = [1, 1]} : vector<4x256xf32> to vector<1x256xf32>
    %23 = vector.broadcast %22 : vector<1x256xf32> to vector<16x256xf32>
    %24 = arith.mulf %8, %23 : vector<16x256xf32>
    %25 = vector.extract_strided_slice %21 {offsets = [1, 0], sizes = [1, 256], strides = [1, 1]} : vector<4x256xf32> to vector<1x256xf32>
    %26 = vector.broadcast %25 : vector<1x256xf32> to vector<16x256xf32>
    %27 = arith.mulf %11, %26 : vector<16x256xf32>
    %28 = arith.addf %24, %27 : vector<16x256xf32>
    %29 = vector.extract_strided_slice %21 {offsets = [2, 0], sizes = [1, 256], strides = [1, 1]} : vector<4x256xf32> to vector<1x256xf32>
    %30 = vector.broadcast %29 : vector<1x256xf32> to vector<16x256xf32>
    %31 = arith.mulf %14, %30 : vector<16x256xf32>
    %32 = arith.addf %28, %31 : vector<16x256xf32>
    %33 = vector.extract_strided_slice %21 {offsets = [3, 0], sizes = [1, 256], strides = [1, 1]} : vector<4x256xf32> to vector<1x256xf32>
    %34 = vector.broadcast %33 : vector<1x256xf32> to vector<16x256xf32>
    %35 = arith.mulf %17, %34 : vector<16x256xf32>
    %36 = arith.addf %32, %35 : vector<16x256xf32>
    %cst_5 = arith.constant 2.000000e+00 : f32
    %37 = vector.broadcast %cst_5 : f32 to vector<16x256xf32>
    %38 = arith.mulf %37, %36 : vector<16x256xf32>
    %39 = arith.subf %5, %38 : vector<16x256xf32>
    %cst_6 = arith.constant dense<0x7F800000> : vector<256xf32>
    %40 = vector.multi_reduction <minimumf>, %39, %cst_6 [0] : vector<16x256xf32> to vector<256xf32>
    %41 = vector.shape_cast %40 : vector<256xf32> to vector<1x256xf32>
    %42 = vector.broadcast %41 : vector<1x256xf32> to vector<16x256xf32>
    %43 = arith.cmpf oeq, %39, %42 : vector<16x256xf32>
    %c16_i32 = arith.constant 16 : i32
    %44 = vector.broadcast %c16_i32 : i32 to vector<16x256xi32>
    %45 = arith.select %43, %18, %44 : vector<16x256xi1>, vector<16x256xi32>
    %cst_7 = arith.constant dense<2147483647> : vector<256xi32>
    %46 = vector.multi_reduction <minsi>, %45, %cst_7 [0] : vector<16x256xi32> to vector<256xi32>
    %47 = vector.shape_cast %46 : vector<256xi32> to vector<1x256xi32>
    %c0_8 = arith.constant 0 : index
    %c0_9 = arith.constant 0 : index
    %c0_10 = arith.constant 0 : index
    %48 = vector.load %arg5[%c0_8, %c0_9, %c0_10] : memref<1x1x256xi32, #tpu.memory_space<vmem>>, vector<1x1x256xi32>
    %49 = vector.shape_cast %48 : vector<1x1x256xi32> to vector<1x256xi32>
    %50 = vector.shape_cast %47 : vector<1x256xi32> to vector<1x1x256xi32>
    tpu.vector_store %arg5[%c0_8, %c0_9, %c0_10], %50 {strides = array<i32>} : memref<1x1x256xi32, #tpu.memory_space<vmem>>, vector<1x1x256xi32>,
    %51 = vector.broadcast %47 : vector<1x256xi32> to vector<16x256xi32>
    %52 = arith.cmpi eq, %18, %51 : vector<16x256xi32>
    %53 = arith.extui %52 : vector<16x256xi1> to vector<16x256xi32>
    %54 = arith.sitofp %53 : vector<16x256xi32> to vector<16x256xf32>
    %55 = vector.extract_strided_slice %21 {offsets = [0, 0], sizes = [1, 256], strides = [1, 1]} : vector<4x256xf32> to vector<1x256xf32>
    %56 = arith.mulf %54, %8 : vector<16x256xf32>
    %cst_11 = arith.constant dense<0.000000e+00> : vector<256xf32>
    %57 = vector.multi_reduction <add>, %56, %cst_11 [0] : vector<16x256xf32> to vector<256xf32>
    %58 = vector.shape_cast %57 : vector<256xf32> to vector<1x256xf32>
    %59 = arith.subf %58, %55 : vector<1x256xf32>
    %60 = arith.addf %55, %59 : vector<1x256xf32>
    %c0_12 = arith.constant 0 : index
    %c0_13 = arith.constant 0 : index
    %c0_14 = arith.constant 0 : index
    %61 = vector.load %arg4[%c0_12, %c0_13, %c0_14] : memref<1x4x256xf32, #tpu.memory_space<vmem>>, vector<1x1x256xf32>
    %62 = vector.shape_cast %61 : vector<1x1x256xf32> to vector<1x256xf32>
    %63 = vector.shape_cast %60 : vector<1x256xf32> to vector<1x1x256xf32>
    tpu.vector_store %arg4[%c0_12, %c0_13, %c0_14], %63 {strides = array<i32>} : memref<1x4x256xf32, #tpu.memory_space<vmem>>, vector<1x1x256xf32>,
    %64 = arith.mulf %59, %59 : vector<1x256xf32>
    %65 = arith.addf %19, %64 : vector<1x256xf32>
    %66 = vector.extract_strided_slice %21 {offsets = [1, 0], sizes = [1, 256], strides = [1, 1]} : vector<4x256xf32> to vector<1x256xf32>
    %67 = arith.mulf %54, %11 : vector<16x256xf32>
    %cst_15 = arith.constant dense<0.000000e+00> : vector<256xf32>
    %68 = vector.multi_reduction <add>, %67, %cst_15 [0] : vector<16x256xf32> to vector<256xf32>
    %69 = vector.shape_cast %68 : vector<256xf32> to vector<1x256xf32>
    %70 = arith.subf %69, %66 : vector<1x256xf32>
    %71 = arith.addf %66, %70 : vector<1x256xf32>
    %c0_16 = arith.constant 0 : index
    %c1 = arith.constant 1 : index
    %c0_17 = arith.constant 0 : index
    %72 = vector.load %arg4[%c0_16, %c1, %c0_17] : memref<1x4x256xf32, #tpu.memory_space<vmem>>, vector<1x1x256xf32>
    %73 = vector.shape_cast %72 : vector<1x1x256xf32> to vector<1x256xf32>
    %74 = vector.shape_cast %71 : vector<1x256xf32> to vector<1x1x256xf32>
    tpu.vector_store %arg4[%c0_16, %c1, %c0_17], %74 {strides = array<i32>} : memref<1x4x256xf32, #tpu.memory_space<vmem>>, vector<1x1x256xf32>,
    %75 = arith.mulf %70, %70 : vector<1x256xf32>
    %76 = arith.addf %65, %75 : vector<1x256xf32>
    %77 = vector.extract_strided_slice %21 {offsets = [2, 0], sizes = [1, 256], strides = [1, 1]} : vector<4x256xf32> to vector<1x256xf32>
    %78 = arith.mulf %54, %14 : vector<16x256xf32>
    %cst_18 = arith.constant dense<0.000000e+00> : vector<256xf32>
    %79 = vector.multi_reduction <add>, %78, %cst_18 [0] : vector<16x256xf32> to vector<256xf32>
    %80 = vector.shape_cast %79 : vector<256xf32> to vector<1x256xf32>
    %81 = arith.subf %80, %77 : vector<1x256xf32>
    %82 = arith.addf %77, %81 : vector<1x256xf32>
    %c0_19 = arith.constant 0 : index
    %c2 = arith.constant 2 : index
    %c0_20 = arith.constant 0 : index
    %83 = vector.load %arg4[%c0_19, %c2, %c0_20] : memref<1x4x256xf32, #tpu.memory_space<vmem>>, vector<1x1x256xf32>
    %84 = vector.shape_cast %83 : vector<1x1x256xf32> to vector<1x256xf32>
    %85 = vector.shape_cast %82 : vector<1x256xf32> to vector<1x1x256xf32>
    tpu.vector_store %arg4[%c0_19, %c2, %c0_20], %85 {strides = array<i32>} : memref<1x4x256xf32, #tpu.memory_space<vmem>>, vector<1x1x256xf32>,
    %86 = arith.mulf %81, %81 : vector<1x256xf32>
    %87 = arith.addf %76, %86 : vector<1x256xf32>
    %88 = vector.extract_strided_slice %21 {offsets = [3, 0], sizes = [1, 256], strides = [1, 1]} : vector<4x256xf32> to vector<1x256xf32>
    %89 = arith.mulf %54, %17 : vector<16x256xf32>
    %cst_21 = arith.constant dense<0.000000e+00> : vector<256xf32>
    %90 = vector.multi_reduction <add>, %89, %cst_21 [0] : vector<16x256xf32> to vector<256xf32>
    %91 = vector.shape_cast %90 : vector<256xf32> to vector<1x256xf32>
    %92 = arith.subf %91, %88 : vector<1x256xf32>
    %93 = arith.addf %88, %92 : vector<1x256xf32>
    %c0_22 = arith.constant 0 : index
    %c3 = arith.constant 3 : index
    %c0_23 = arith.constant 0 : index
    %94 = vector.load %arg4[%c0_22, %c3, %c0_23] : memref<1x4x256xf32, #tpu.memory_space<vmem>>, vector<1x1x256xf32>
    %95 = vector.shape_cast %94 : vector<1x1x256xf32> to vector<1x256xf32>
    %96 = vector.shape_cast %93 : vector<1x256xf32> to vector<1x1x256xf32>
    tpu.vector_store %arg4[%c0_22, %c3, %c0_23], %96 {strides = array<i32>} : memref<1x4x256xf32, #tpu.memory_space<vmem>>, vector<1x1x256xf32>,
    %97 = arith.mulf %92, %92 : vector<1x256xf32>
    %98 = arith.addf %87, %97 : vector<1x256xf32>
    %cst_24 = arith.constant 0.000000e+00 : f32
    %99 = vector.broadcast %cst_24 : f32 to vector<8x128xf32>
    %100 = vector.shape_cast %98 : vector<1x256xf32> to vector<1x1x256xf32>
    %cst_25 = arith.constant dense<0.000000e+00> : vector<1xf32>
    %101 = vector.multi_reduction <add>, %100, %cst_25 [1, 2] : vector<1x1x256xf32> to vector<1xf32>
    %102 = vector.shape_cast %101 : vector<1xf32> to vector<1x1x1xf32>
    %103 = vector.extract %102[0, 0, 0] : f32 from vector<1x1x1xf32>
    %104 = vector.broadcast %103 : f32 to vector<8x128xf32>
    %105 = arith.addf %99, %104 : vector<8x128xf32>
    %c0_26 = arith.constant 0 : index
    %c0_27 = arith.constant 0 : index
    %c0_28 = arith.constant 0 : index
    %c0_29 = arith.constant 0 : index
    %106 = vector.load %arg6[%c0_26, %c0_27, %c0_28, %c0_29] : memref<1x1x8x128xf32, #tpu.memory_space<vmem>>, vector<1x1x8x128xf32>
    %107 = vector.shape_cast %106 : vector<1x1x8x128xf32> to vector<8x128xf32>
    %108 = vector.shape_cast %105 : vector<8x128xf32> to vector<1x1x8x128xf32>
    tpu.vector_store %arg6[%c0_26, %c0_27, %c0_28, %c0_29], %108 {strides = array<i32>} : memref<1x1x8x128xf32, #tpu.memory_space<vmem>>, vector<1x1x8x128xf32>,
    return
  }
  func.func @transform_0(%arg0: i32, %arg1: i32) -> (i32, i32, i32) {
    %c0_i32 = arith.constant 0 : i32
    %c0_i32_0 = arith.constant 0 : i32
    return %arg0, %c0_i32, %arg1 : i32, i32, i32
  }
  func.func @transform_1(%arg0: i32, %arg1: i32) -> (i32, i32) {
    %c0_i32 = arith.constant 0 : i32
    %c0_i32_0 = arith.constant 0 : i32
    %c0_i32_1 = arith.constant 0 : i32
    return %c0_i32, %c0_i32_0 : i32, i32
  }
  func.func @transform_2(%arg0: i32, %arg1: i32) -> (i32, i32, i32) {
    %c0_i32 = arith.constant 0 : i32
    %c0_i32_0 = arith.constant 0 : i32
    return %arg0, %c0_i32, %arg1 : i32, i32, i32
  }
  func.func @transform_3(%arg0: i32, %arg1: i32) -> (i32, i32, i32) {
    %c0_i32 = arith.constant 0 : i32
    %c0_i32_0 = arith.constant 0 : i32
    return %arg0, %c0_i32, %arg1 : i32, i32, i32
  }
  func.func @transform_4(%arg0: i32, %arg1: i32) -> (i32, i32, i32, i32) {
    %c0_i32 = arith.constant 0 : i32
    %c0_i32_0 = arith.constant 0 : i32
    %c0_i32_1 = arith.constant 0 : i32
    return %arg0, %arg1, %c0_i32, %c0_i32_0 : i32, i32, i32, i32
  }
}

</mosaic_0001>

<bundles_post_ra>
// kernel: tpu_custom_call.1
= control target key start
LH: loop header
LB: loop body
LE: loop exit
PB: predicated region body
PF: predicated region fallthrough
CT: control target
= control target key end

     0   :  { %10 = vsyncpa [#allocation3], 0  ;;  %s1521_s0 = inlined_call_operand.vmem [shape: f32[2,4,256], index: 0, kind: input, shape index: {}]   ;;  %s1522_s1 = inlined_call_operand.vmem [shape: f32[16,4], index: 1, kind: input, shape index: {}]   ;;  %s1523_s2 = inlined_call_operand.hbm [shape: f32[2,4,256], index: 2, kind: output, shape index: {0}]   ;;  %s1524_s3 = inlined_call_operand.hbm [shape: s32[2,1,256], index: 3, kind: output, shape index: {1}]   ;;  %s1525_s4 = inlined_call_operand.hbm [shape: f32[2,1,8,128], index: 4, kind: output, shape index: {2}]  }
   0x1   :  { %12 = vsyncpa [#allocation3 + $0x1], 0 }
   0x2   :  { %13 = vsyncpa [#allocation5], 0 }
   0x3   :  { %15 = vsyncpa [#allocation5 + $0x1], 0  ;;  %s1175_s15 = smov 0   ;;  %s1177_s16 = smov 0  }
   0x4   :  { %s1179_s17 = smov 0   ;;  %s1181_s18 = smov 0  }
   0x5   :  { %s1183_s19 = smov 0   ;;  %s1185_s20 = smov 0  }
   0x6 LB: > { %s892_s21 = sadd.s32 4294967295, %s1139_s20   ;;  %s1526_s22 = sadd.s32 4294967294, %s1139_s20   ;;  %s1139_s20 = sphi %s1185_s20, %s21_s20   ;;  %s1135_s19 = sphi %s1183_s19, %s1540_s19   ;;  %s1131_s18 = sphi %s1181_s18, %s1539_s18   ;;  %s1127_s17 = sphi %s1179_s17, %s1538_s17   ;;  %s1123_s16 = sphi %s1177_s16, %s1537_s16   ;;  %s1119_s15 = sphi %s1175_s15, %s1536_s15  }
   0x7   : > { %s33_s23 = sadd.s32 1, %s1135_s19  ;;  %s91_s24 = sadd.s32 1, %s1127_s17 }
   0x8   : > { %p35_p0 = scmp.ge.s32.totalorder %s33_s23, 2  ;;  %p101_p1 = scmp.ne.s32.totalorder %s1127_s17, %s1123_s16 }
   0x9   : > { %p102_p2 = scmp.eq.s32.totalorder %s892_s21, 1  ;;  %p107_p3 = scmp.ne.s32.totalorder %s1123_s16, %s1119_s15 }
   0xa   : > { %s1542_s23 = smov (%p35_p0, %s33_s23), 0  ;;  %p108_p5 = scmp.eq.s32.totalorder %s1526_s22, 1 }
   0xb   : > { %p1217_p4 = por %p102_p2, %p101_p1  ;;  %s86_s26 = ssub.s32 %s1135_s19, %s1542_s23 }
   0xc   : > { %p896_p6 = scmp.ge.s32.totalorder %s1139_s20, 1  ;;  %p89_p7 = scmp.eq.s32.totalorder %s86_s26, 0 }
   0xd   : > { %p1226_p8 = por %p108_p5, %p107_p3  ;;  %p198_p9 = scmp.lt.s32.totalorder %s1139_s20, 3 }
   0xe   : > { %s1232_s28 = scalar_select %p89_p7, %s1127_s17, %s91_s24  }
   0xf   : > { %p199_p10 = pnand %p896_p6, %p198_p9 }
  0x10   : > { %v250_v0 = vld [vmem:[%s1522_s1] sm:$0xff] (!%p199_p10)  ;;  %v1141_v1 = vmov (!%p199_p10), 1   ;;  %v1142_v2 = vmov (!%p199_p10), 0   ;;  %v251_v3 = vld [vmem:[%s1522_s1 + $0x8] sm:$0xff] (!%p199_p10)  ;;  %v1143_v4 = vmov (!%p199_p10), 2   ;;  %v1144_v5 = vmov (!%p199_p10), 3  }
  0x11   : > { %202 = sbr.rel (%p199_p10) target bundleno = 501 (0x1f5), region = 28  ;;  %996 = vset.pattern.permute.xlu1 (!%p199_p10), %v1141_v1  ;;  %995 = vset.pattern.permute.xlu0 (!%p199_p10), %v1142_v2  ;;  %v253_v6 = vmul.f32 (!%p199_p10), %v251_v3, %v251_v3  ;;  %vm254_vm0 = vcmask (!%p199_p10), 31744   ;;  %v252_v8 = vmul.f32 (!%p199_p10), %v250_v0, %v250_v0  ;;  %p239_p11 = scmp.lt.s32.totalorder (!%p199_p10), %s1131_s18, 1  ;;  %v295_v10 = vlaneseq (!%p199_p10) }
  0x12   : > { %272 = vperm.xlu1 (!%p199_p10), %996, %v250_v0   ;;  %263 = vperm.xlu0 (!%p199_p10), %995, %v250_v0   ;;  %s1361_s12 = sand.u32 (!%p199_p10), 1, %s1123_s16   ;;  %s1406_s30 = sand.u32 (!%p199_p10), 1, %s892_s21  }
  0x13   : > { %v258_v7 = vsel (!%p199_p10), %vm254_vm0, %v253_v6, 0.0  ;;  %v255_v9 = vsel (!%p199_p10), %vm254_vm0, %v252_v8, 0.0  ;;  %v1243_v11 = vshrl.u32 (!%p199_p10), %v295_v10, 7  ;;  %s897_s13 = sshll.u32 (!%p199_p10), %s1361_s12, 3  ;;  %s898_s14 = sshll.u32 (!%p199_p10), %s1361_s12, 1 }
  0x14   : > { %s230_s24 = scalar_lea.vmem (!%p199_p10), [#allocation4], %s898_s14  ;;  %s223_s26 = scalar_lea.vmem (!%p199_p10), [#allocation2], %s897_s13 }
  0x15   : > { %v324_v14 = vsub.s32 (!%p199_p10), 1, %v1243_v11  ;;  %v328_v15 = vsub.s32 (!%p199_p10), 5, %v1243_v11  ;;  %v302_v16 = vsub.s32 (!%p199_p10), 0, %v1243_v11  ;;  %v306_v17 = vsub.s32 (!%p199_p10), 4, %v1243_v11  ;;  %s721_s29 = sshll.u32 (!%p199_p10), %s223_s26, 4  ;;  %s921_s5 = sshll.u32 (!%p199_p10), %s1131_s18, 5  ;;  %s1402_s29 = int_to_ptr.vmem [resolvable:$true] %s721_s29 }
  0x16   : > { %276 = vperm.xlu1 (!%p199_p10), %996, %v251_v3   ;;  %268 = vperm.xlu0 (!%p199_p10), %995, %v251_v3   ;;  %v350_v19 = vsub.s32 (!%p199_p10), 2, %v1243_v11  ;;  %v354_v20 = vsub.s32 (!%p199_p10), 6, %v1243_v11  ;;  %v376_v29 = vsub.s32 (!%p199_p10), 3, %v1243_v11  ;;  %v380_v30 = vsub.s32 (!%p199_p10), 7, %v1243_v11  ;;  %s737_s9 = sshll.u32 (!%p199_p10), %s230_s24, 4  ;;  %s1528_s10 = sshll.u32 (!%p199_p10), %s1131_s18, 7  ;;  %s1414_s9 = int_to_ptr.vmem [resolvable:$true] %s737_s9 }
  0x17   : > { %s1001_s14 = scalar_lea.vmem (!%p199_p10), %s1414_s9, 32  ;;  %s1147_s21 = smov (!%p199_p10), [#allocation4]  }
  0x18   : > { %s240_s7 = scalar_select %p239_p11, %s1131_s18, 1 }
  0x19   : > { %p1002_p12 = scmp.ne.s32.totalorder %s1414_s9, %s1001_s14 }
  0x1a   : > { %998 = vset.pattern.permute.xlu1 %v1143_v4  ;;  %997 = vset.pattern.permute.xlu0 %v1143_v4  ;;  %s919_s8 = sshll.u32 %s240_s7, 3 }
  0x1b   : > { %284 = vperm.xlu1 %998, %v251_v3   ;;  %280 = vperm.xlu0 %997, %v250_v0   ;;  %s246_s11 = scalar_lea.vmem %s1521_s0, %s919_s8  ;;  %s1412_s8 = scalar_lea.hbm %s1524_s3, %s921_s5 }
  0x1c   : > { %v1256_v18 = vld [vmem:[%s246_s11] sm:$0xff]  ;;  %s1527_s11 = scalar_lea.sflag [#allocation5], %s1406_s30  ;;  %p1003_p13 = pnand %p1002_p12, %p1217_p4 }
  0x1d   : > { %v1263_v22 = vrot.slane %v1256_v18, %v324_v14  ;;  %v1266_v23 = vrot.slane %v1256_v18, %v328_v15  ;;  %v1269_v24 = vrot.slane %v1256_v18, %v302_v16  ;;  %v1272_v25 = vrot.slane %v1256_v18, %v306_v17 }
  0x1e   : > { %v1277_v27 = vrot.slane %v1256_v18, %v350_v19  ;;  %v1280_v28 = vrot.slane %v1256_v18, %v354_v20  ;;  %v1295_v39 = vrot.slane %v1256_v18, %v376_v29  ;;  %v1298_v40 = vrot.slane %v1256_v18, %v380_v30  ;;  %p1004_p0 = pneg %p1003_p13 }
  0x1f   : > { %999 = vset.pattern.permute.xlu0 %v1144_v5  ;;  %1000 = vset.pattern.permute.xlu1 %v1144_v5  ;;  %v335_v31 = vrot.slane %v1263_v22, %v324_v14  ;;  %v339_v32 = vrot.slane %v1266_v23, %v324_v14  ;;  %v313_v33 = vrot.slane %v1269_v24, %v302_v16 }
  0x20   : > { %v317_v34 = vrot.slane %v1272_v25, %v302_v16  ;;  %v361_v37 = vrot.slane %v1277_v27, %v350_v19  ;;  %v365_v38 = vrot.slane %v1280_v28, %v350_v19  ;;  %v387_v53 = vrot.slane %v1295_v39, %v376_v29 }
  0x21   : > { %v391_v54 = vrot.slane %v1298_v40, %v376_v29 }
  0x3a   : > { %259 = vadd.xlane.f32.xlu0 %v258_v7 }
  0x3f   : > { %256 = vadd.xlane.f32.xlu1 %v255_v9 }
  0x50   : > { %288 = vperm.xlu0 %999, %v250_v0   ;;  %292 = vperm.xlu1 %1000, %v251_v3  }
  0x91   : > { %v1245_v12 = vpop.permute.xlu0 %263  ;;  %v1247_v13 = vpop.permute.xlu1 %272 }
  0x92   : > { %v340_v41 = vmul.f32 %v335_v31, %v1247_v13  ;;  %v341_v42 = vmul.f32 %v339_v32, %v1247_v13  ;;  %v318_v43 = vmul.f32 %v313_v33, %v1245_v12  ;;  %v319_v44 = vmul.f32 %v317_v34, %v1245_v12 }
  0x94   : > { %v344_v57 = vadd.f32 %v340_v41, %v318_v43  ;;  %v345_v58 = vadd.f32 %v341_v42, %v319_v44 }
  0x95   : > { %v1260_v21 = vpop.permute.xlu0 %268  ;;  %v1274_v26 = vpop.permute.xlu1 %276 }
  0x96   : > { %v342_v45 = vmul.f32 %v335_v31, %v1274_v26  ;;  %v343_v46 = vmul.f32 %v339_v32, %v1274_v26  ;;  %v320_v47 = vmul.f32 %v313_v33, %v1260_v21  ;;  %v321_v48 = vmul.f32 %v317_v34, %v1260_v21 }
  0x98   : > { %v346_v59 = vadd.f32 %v342_v45, %v320_v47  ;;  %v347_v60 = vadd.f32 %v343_v46, %v321_v48  ;;  %v297_v48 = vadd.s32 8, %v1243_v11 }
  0x9a   : > { %v1288_v35 = vpop.permute.xlu0 %280  ;;  %v1290_v36 = vpop.permute.xlu1 %284 }
  0x9b   : > { %v366_v50 = vmul.f32 %v361_v37, %v1288_v35  ;;  %v367_v51 = vmul.f32 %v365_v38, %v1288_v35  ;;  %v368_v55 = vmul.f32 %v361_v37, %v1290_v36  ;;  %v369_v56 = vmul.f32 %v365_v38, %v1290_v36 }
  0x9d   : > { %v370_v62 = vadd.f32 %v366_v50, %v344_v57  ;;  %v371_v63 = vadd.f32 %v367_v51, %v345_v58  ;;  %v372_v3 = vadd.f32 %v368_v55, %v346_v59  ;;  %v373_v4 = vadd.f32 %v369_v56, %v347_v60 }
  0xc7   : > { %v260_v49 = vpop.xlane.xlu0 %259 }
  0xcc   : > { %v257_v52 = vpop.xlane.xlu1 %256 }
  0xcf   : > { %v1314_v61 = vpop.permute.xlu0 %288 }
  0xd0   : > { %v392_v0 = vmul.f32 %v387_v53, %v1314_v61  ;;  %v393_v1 = vmul.f32 %v391_v54, %v1314_v61  ;;  %v1318_v2 = vpop.permute.xlu1 %292 }
  0xd1   : > { %v394_v5 = vmul.f32 %v387_v53, %v1318_v2  ;;  %v395_v6 = vmul.f32 %v391_v54, %v1318_v2 }
  0xd2   : > { %v396_v7 = vadd.f32 %v392_v0, %v370_v62  ;;  %v397_v8 = vadd.f32 %v393_v1, %v371_v63  ;;  %v1145_v62 = vmov 1966171168  }
  0xd3   : > { %v398_v9 = vadd.f32 %v394_v5, %v372_v3  ;;  %v399_v14 = vadd.f32 %v395_v6, %v373_v4  ;;  %v454_v63 = vunpack.c.l.s4 %v1145_v62 }
  0xd4   : > { %v400_v15 = vmul.f32 2.0, %v396_v7  ;;  %v401_v16 = vmul.f32 2.0, %v397_v8 }
  0xd5   : > { %v402_v17 = vmul.f32 2.0, %v398_v9  ;;  %v403_v19 = vmul.f32 2.0, %v399_v14  ;;  %v455_v5 = vunpack.c.0.s8 %v454_v63 }
  0xd6   : > { %v404_v20 = vsub.f32 %v257_v52, %v400_v15  ;;  %v405_v29 = vsub.f32 %v257_v52, %v401_v16  ;;  %v1146_v15 = vmov 0.0  }
  0xd7   : > { %v406_v30 = vsub.f32 %v260_v49, %v402_v17  ;;  %v407_v31 = vsub.f32 %v260_v49, %v403_v19  ;;  %v1330_v14 = vsub.s32 %v455_v5, %v1243_v11 }
  0xd9   : > { %v408_v32 = vmin.f32 %v404_v20, %v406_v30  ;;  %v415_v33 = vmin.f32 %v405_v29, %v407_v31 }
  0xdb   : > { %v409_v34 = vrot.slane %v408_v32, 4  ;;  %v416_v37 = vrot.slane %v415_v33, 4 }
  0xdd   : > { %v410_v38 = vmin.f32 %v408_v32, %v409_v34  ;;  %v417_v41 = vmin.f32 %v415_v33, %v416_v37 }
  0xdf   : > { %v411_v42 = vrot.slane %v410_v38, 2  ;;  %v418_v43 = vrot.slane %v417_v41, 2 }
  0xe1   : > { %v412_v44 = vmin.f32 %v410_v38, %v411_v42  ;;  %v419_v45 = vmin.f32 %v417_v41, %v418_v43 }
  0xe3   : > { %v413_v46 = vrot.slane %v412_v44, 1  ;;  %v420_v47 = vrot.slane %v419_v45, 1 }
  0xe5   : > { %v414_v50 = vmin.f32 %v412_v44, %v413_v46  ;;  %v421_v51 = vmin.f32 %v419_v45, %v420_v47 }
  0xe7   : > { %vm422_vm1 = vcmp.eq.f32.partialorder %v404_v20, %v414_v50  ;;  %vm423_vm2 = vcmp.eq.f32.partialorder %v405_v29, %v421_v51  ;;  %vm424_vm3 = vcmp.eq.f32.partialorder %v406_v30, %v414_v50  ;;  %vm425_vm4 = vcmp.eq.f32.partialorder %v407_v31, %v421_v51 }
  0xe8   : > { %v426_v49 = vsel %vm422_vm1, %v1243_v11, 16  ;;  %v427_v52 = vsel %vm423_vm2, %v1243_v11, 16  ;;  %v428_v53 = vsel %vm424_vm3, %v297_v48, 16  ;;  %v429_v54 = vsel %vm425_vm4, %v297_v48, 16 }
  0xe9   : > { %vm430_vm5 = vcmp.lt.s32.totalorder %v426_v49, %v428_v53  ;;  %vm441_vm6 = vcmp.lt.s32.totalorder %v427_v52, %v429_v54  ;;  %vm678_vm1 = vcmask 1040384   ;;  %vm1376_vm2 = vcmp.lt.s32.totalorder %v295_v10, 256 }
  0xea   : > { %v431_v55 = vsel %vm430_vm5, %v426_v49, %v428_v53  ;;  %v442_v56 = vsel %vm441_vm6, %v427_v52, %v429_v54 }
  0xeb   : > { %v432_v57 = vrot.slane %v431_v55, 4  ;;  %v443_v58 = vrot.slane %v442_v56, 4 }
  0xed   : > { %vm433_vm7 = vcmp.lt.s32.totalorder %v431_v55, %v432_v57  ;;  %vm444_vm8 = vcmp.lt.s32.totalorder %v442_v56, %v443_v58 }
  0xee   : > { %v434_v59 = vsel %vm433_vm7, %v431_v55, %v432_v57  ;;  %v445_v60 = vsel %vm444_vm8, %v442_v56, %v443_v58 }
  0xef   : > { %v435_v0 = vrot.slane %v434_v59, 2  ;;  %v446_v1 = vrot.slane %v445_v60, 2 }
  0xf1   : > { %vm436_vm9 = vcmp.lt.s32.totalorder %v434_v59, %v435_v0  ;;  %vm447_vm10 = vcmp.lt.s32.totalorder %v445_v60, %v446_v1 }
  0xf2   : > { %v437_v3 = vsel %vm436_vm9, %v434_v59, %v435_v0  ;;  %v448_v4 = vsel %vm447_vm10, %v445_v60, %v446_v1 }
  0xf3   : > { %v438_v6 = vrot.slane %v437_v3, 1  ;;  %v449_v7 = vrot.slane %v448_v4, 1 }
  0xf5   : > { %vm439_vm11 = vcmp.lt.s32.totalorder %v437_v3, %v438_v6  ;;  %vm450_vm12 = vcmp.lt.s32.totalorder %v448_v4, %v449_v7 }
  0xf6   : > { %v1325_v8 = vsel %vm439_vm11, %v437_v3, %v438_v6  ;;  %v1327_v9 = vsel %vm450_vm12, %v448_v4, %v449_v7 }
  0xf7   : > { %vm472_vm13 = vcmp.eq.s32.totalorder %v1243_v11, %v1325_v8  ;;  %vm473_vm14 = vcmp.eq.s32.totalorder %v1243_v11, %v1327_v9  ;;  %vm474_vm15 = vcmp.eq.s32.totalorder %v297_v48, %v1325_v8  ;;  %vm475_vm0 = vcmp.eq.s32.totalorder %v297_v48, %v1327_v9 }
  0xf8   : > { %v902_v16 = vsel %vm472_vm13, 1.0, %v1146_v15  ;;  %v903_v17 = vsel %vm473_vm14, 1.0, %v1146_v15  ;;  %v904_v19 = vsel %vm474_vm15, 1.0, %v1146_v15  ;;  %v905_v20 = vsel %vm475_vm0, 1.0, %v1146_v15 }
  0xf9   : > { %v484_v29 = vmul.f32 %v902_v16, %v1245_v12  ;;  %v485_v30 = vmul.f32 %v903_v17, %v1245_v12  ;;  %v486_v31 = vmul.f32 %v904_v19, %v1260_v21  ;;  %v487_v32 = vmul.f32 %v905_v20, %v1260_v21 }
  0xfa   : > { %v530_v33 = vmul.f32 %v902_v16, %v1247_v13  ;;  %v531_v11 = vmul.f32 %v903_v17, %v1247_v13  ;;  %v532_v34 = vmul.f32 %v904_v19, %v1274_v26  ;;  %v533_v37 = vmul.f32 %v905_v20, %v1274_v26 }
  0xfb   : > { %v488_v38 = vadd.f32 %v486_v31, %v484_v29  ;;  %v495_v41 = vadd.f32 %v487_v32, %v485_v30  ;;  %v579_v42 = vmul.f32 %v902_v16, %v1288_v35  ;;  %v580_v43 = vmul.f32 %v903_v17, %v1288_v35 }
  0xfc   : > { %v534_v44 = vadd.f32 %v532_v34, %v530_v33  ;;  %v541_v12 = vadd.f32 %v533_v37, %v531_v11  ;;  %v581_v45 = vmul.f32 %v904_v19, %v1290_v36  ;;  %v582_v21 = vmul.f32 %v905_v20, %v1290_v36 }
  0xfd   : > { %v489_v46 = vrot.slane %v488_v38, 4  ;;  %v496_v47 = vrot.slane %v495_v41, 4  ;;  %v628_v13 = vmul.f32 %v902_v16, %v1314_v61  ;;  %v629_v48 = vmul.f32 %v903_v17, %v1314_v61 }
  0xfe   : > { %v535_v50 = vrot.slane %v534_v44, 4  ;;  %v542_v26 = vrot.slane %v541_v12, 4  ;;  %v583_v51 = vadd.f32 %v581_v45, %v579_v42  ;;  %v590_v49 = vadd.f32 %v582_v21, %v580_v43 }
  0xff   : > { %v490_v52 = vadd.f32 %v489_v46, %v488_v38  ;;  %v497_v53 = vadd.f32 %v496_v47, %v495_v41  ;;  %v630_v35 = vmul.f32 %v904_v19, %v1318_v2  ;;  %v631_v54 = vmul.f32 %v905_v20, %v1318_v2 }
 0x100   : > { %v536_v55 = vadd.f32 %v535_v50, %v534_v44  ;;  %v543_v56 = vadd.f32 %v542_v26, %v541_v12  ;;  %v584_v57 = vrot.slane %v583_v51, 4  ;;  %v591_v36 = vrot.slane %v590_v49, 4 }
 0x101   : > { %v632_v58 = vadd.f32 %v630_v35, %v628_v13  ;;  %v639_v59 = vadd.f32 %v631_v54, %v629_v48  ;;  %v491_v60 = vrot.slane %v490_v52, 2  ;;  %v498_v62 = vrot.slane %v497_v53, 2 }
 0x102   : > { %v537_v63 = vrot.slane %v536_v55, 2  ;;  %v544_v61 = vrot.slane %v543_v56, 2  ;;  %v585_v0 = vadd.f32 %v584_v57, %v583_v51  ;;  %v592_v1 = vadd.f32 %v591_v36, %v590_v49 }
 0x103   : > { %v633_v3 = vrot.slane %v632_v58, 4  ;;  %v640_v4 = vrot.slane %v639_v59, 4  ;;  %v492_v5 = vadd.f32 %v491_v60, %v490_v52  ;;  %v499_v6 = vadd.f32 %v498_v62, %v497_v53 }
 0x104   : > { %v538_v7 = vadd.f32 %v537_v63, %v536_v55  ;;  %v545_v15 = vadd.f32 %v544_v61, %v543_v56  ;;  %v586_v16 = vrot.slane %v585_v0, 2  ;;  %v593_v2 = vrot.slane %v592_v1, 2 }
 0x105   : > { %v634_v17 = vadd.f32 %v633_v3, %v632_v58  ;;  %v641_v19 = vadd.f32 %v640_v4, %v639_v59  ;;  %v493_v20 = vrot.slane %v492_v5, 1  ;;  %v500_v29 = vrot.slane %v499_v6, 1 }
 0x106   : > { %v539_v30 = vrot.slane %v538_v7, 1  ;;  %v546_v31 = vrot.slane %v545_v15, 1  ;;  %v587_v32 = vadd.f32 %v586_v16, %v585_v0  ;;  %v594_v33 = vadd.f32 %v593_v2, %v592_v1 }
 0x107   : > { %v635_v11 = vrot.slane %v634_v17, 2  ;;  %v642_v34 = vrot.slane %v641_v19, 2  ;;  %v494_v37 = vadd.f32 %v493_v20, %v492_v5  ;;  %v501_v38 = vadd.f32 %v500_v29, %v499_v6 }
 0x108   : > { %v540_v41 = vadd.f32 %v539_v30, %v538_v7  ;;  %v547_v42 = vadd.f32 %v546_v31, %v545_v15  ;;  %v588_v43 = vrot.slane %v587_v32, 1  ;;  %v595_v44 = vrot.slane %v594_v33, 1 }
 0x109   : > { %v636_v12 = vadd.f32 %v635_v11, %v634_v17  ;;  %v643_v45 = vadd.f32 %v642_v34, %v641_v19  ;;  %v502_v21 = vsub.f32 %v494_v37, %v1269_v24  ;;  %v503_v46 = vsub.f32 %v501_v38, %v1272_v25 }
 0x10a   : > { %v548_v47 = vsub.f32 %v540_v41, %v1263_v22  ;;  %v549_v13 = vsub.f32 %v547_v42, %v1266_v23  ;;  %v589_v48 = vadd.f32 %v588_v43, %v587_v32  ;;  %v596_v50 = vadd.f32 %v595_v44, %v594_v33 }
 0x10b   : > { %v526_v26 = vmul.f32 %v502_v21, %v502_v21  ;;  %v527_v51 = vmul.f32 %v503_v46, %v503_v46  ;;  %v637_v49 = vrot.slane %v636_v12, 1  ;;  %v644_v52 = vrot.slane %v643_v45, 1 }
 0x10c   : > { %v552_v53 = vcombine.low %v548_v47, %v549_v13  ;;  %v575_v35 = vmul.f32 %v548_v47, %v548_v47  ;;  %v576_v54 = vmul.f32 %v549_v13, %v549_v13  ;;  %v597_v55 = vsub.f32 %v589_v48, %v1277_v27 }
 0x10d   : > { %v598_v24 = vsub.f32 %v596_v50, %v1280_v28  ;;  %v638_v25 = vadd.f32 %v637_v49, %v636_v12  ;;  %v645_v56 = vadd.f32 %v644_v52, %v643_v45  ;;  %v506_v22 = vcombine.low %v502_v21, %v503_v46 }
 0x10e   : > { %v553_v23 = vrot.slane %v552_v53, 7  ;;  %v577_v57 = vadd.f32 %v575_v35, %v526_v26  ;;  %v578_v36 = vadd.f32 %v576_v54, %v527_v51  ;;  %v624_v58 = vmul.f32 %v597_v55, %v597_v55 }
 0x10f   : > { %v601_v59 = vcombine.low %v597_v55, %v598_v24  ;;  %v625_v60 = vmul.f32 %v598_v24, %v598_v24  ;;  %v646_v62 = vsub.f32 %v638_v25, %v1295_v39  ;;  %v647_v63 = vsub.f32 %v645_v56, %v1298_v40 }
 0x110   : > { %v555_v27 = vadd.f32 %v553_v23, %v1256_v18  ;;  %v626_v28 = vadd.f32 %v624_v58, %v577_v57  ;;  %v508_v61 = vadd.f32 %v506_v22, %v1256_v18  ;;  %v452_v0 = vcombine.low %v1325_v8, %v1327_v9 }
 0x111   : > { %v602_v1 = vrot.slane %v601_v59, 6  ;;  %v627_v3 = vadd.f32 %v625_v60, %v578_v36  ;;  %v650_v4 = vcombine.low %v646_v62, %v647_v63  ;;  %v674_v5 = vmul.f32 %v646_v62, %v646_v62 }
 0x112   : > { %v675_v6 = vmul.f32 %v647_v63, %v647_v63  ;;  %v459_v7 = vrot.slane %v452_v0, %v1330_v14  ;;  %v516_v39 = vrot.slane %v508_v61, %v1330_v14  ;;  %v563_v40 = vrot.slane %v555_v27, %v1330_v14 }
 0x113   : > { %v604_v15 = vadd.f32 %v602_v1, %v1256_v18  ;;  %v651_v16 = vrot.slane %v650_v4, 5  ;;  %v676_v2 = vadd.f32 %v674_v5, %v626_v28 }
 0x114   : > { %v677_v8 = vadd.f32 %v675_v6, %v627_v3  ;;  %v466_v9 = vrot.slane %v459_v7, %v1330_v14  ;;  %v523_v19 = vrot.slane %v516_v39, %v1330_v14  ;;  %v564_v20 = vcombine.high %v563_v40, %v563_v40 }
 0x115   : > { %v612_v29 = vrot.slane %v604_v15, %v1330_v14  ;;  %v653_v30 = vadd.f32 %v651_v16, %v1256_v18  ;;  %v679_v31 = vsel %vm678_vm1, %v676_v2, 0.0 }
 0x116   : > { %v680_v32 = vsel %vm678_vm1, %v677_v8, 0.0  ;;  %471 = vst.msk [vmem:[%s230_s24] sm:$0x3] %vm1376_vm2, %v466_v9  ;;  %525 = vst.msk [vmem:[%s223_s26] ss:$4 sm:$0x3] %vm1376_vm2, %v523_v19  ;;  %v571_v10 = vrot.slane %v564_v20, %v1330_v14 }
 0x117   : > { %v661_v33 = vrot.slane %v653_v30, %v1330_v14  ;;  %v681_v18 = vadd.f32 %v680_v32, %v679_v31  ;;  %v619_v11 = vrot.slane %v612_v29, %v1330_v14 }
 0x118   : > { %906 = vst.msk [vmem:[%s223_s26 + $0x1] ss:$4 sm:$0x3] %vm1376_vm2, %v571_v10 }
 0x119   : > { %v662_v34 = vcombine.high %v661_v33, %v661_v33  ;;  %682 = vadd.xlane.f32.xlu1 %v681_v18  ;;  %v620_v37 = vcombine.high %v619_v11, %v619_v11 }
 0x11b   : > { %907 = vst.msk [vmem:[%s223_s26 + $0x2] ss:$4 sm:$0x3] %vm1376_vm2, %v620_v37  ;;  %v669_v38 = vrot.slane %v662_v34, %v1330_v14 }
 0x11d   : > { %v670_v41 = vcombine.high %v669_v38, %v669_v38 }
 0x11f   : > { %908 = vst.msk [vmem:[%s223_s26 + $0x3] ss:$4 sm:$0x3] %vm1376_vm2, %v670_v41  ;;  %s1005_s26 = sshll.u32 %s1147_s21, 4  ;;  %s1006_s26 = int_to_ptr.vmem [resolvable:$false] %s1005_s26 }
 0x120   : > { %s1007_s22 = scalar_lea.vmem %s1006_s26, 64  ;;  %p1008_p1 = scmp.lt.s32.totalorder %s1414_s9, %s1006_s26 }
 0x121   : > { %p1009_p2 = scmp.lt.s32.totalorder %s1007_s22, %s1001_s14 }
 0x123   : > { %p1010_p3 = por %p1009_p2, %p1008_p1 }
 0x125   : > { %p1011_p5 = pnand %p1010_p3, %p1004_p0 }
 0x127   : > { %1014 = shalt.err (!%p1011_p5)
}
 0x128   : > { %s1015_s24 = scalar_lea.hbm %s1412_s8, 32  ;;  %s1019_s7 = scalar_lea.hbm %s1524_s3, 64 }
 0x129   : > { %p1016_p6 = scmp.ne.s32.totalorder %s1412_s8, %s1015_s24  ;;  %p1020_p10 = scmp.lt.u32.totalorder %s1412_s8, %s1524_s3 }
 0x12a   : > { %p1021_p11 = scmp.lt.u32.totalorder %s1019_s7, %s1015_s24  ;;  %p1023_p13 = scmp.lt.u32.totalorder %s1015_s24, %s1412_s8 }
 0x12b   : > { %p1017_p7 = pnand %p1016_p6, %p1217_p4 }
 0x12c   : > { %p1022_p12 = por %p1021_p11, %p1020_p10 }
 0x12d   : > { %p1018_p9 = pneg %p1017_p7 }
 0x12e   : > { %p1024_p0 = por %p1023_p13, %p1022_p12 }
 0x130   : > { %p1025_p1 = pnand %p1024_p0, %p1018_p9 }
 0x132   : > { %1028 = shalt.err (!%p1025_p1)
}
 0x133   : > { %925 = dma.vmem_to_hbm [thread:$0]  (%p1217_p4), %s1414_s9, 32, %s1412_s8, %s1527_s11  }
 0x134   : > { %s719_s24 = scalar_lea.hbm %s1523_s2, %s1528_s10  ;;  %s695_s5 = scalar_lea.sflag [#allocation3], %s1361_s12 }
 0x135   : > { %s1029_s6 = scalar_lea.vmem %s1402_s29, 128  ;;  %s1148_s7 = smov [#allocation2]  }
 0x136   : > { %p1030_p2 = scmp.ne.s32.totalorder %s1402_s29, %s1029_s6  ;;  %s1033_s21 = sshll.u32 %s1148_s7, 4  ;;  %s1034_s21 = int_to_ptr.vmem [resolvable:$false] %s1033_s21 }
 0x137   : > { %s1035_s26 = scalar_lea.vmem %s1034_s21, 256  ;;  %p1036_p6 = scmp.lt.s32.totalorder %s1402_s29, %s1034_s21 }
 0x138   : > { %p1031_p3 = pnand %p1030_p2, %p1217_p4  ;;  %p1037_p7 = scmp.lt.s32.totalorder %s1035_s26, %s1029_s6 }
 0x13a   : > { %p1032_p5 = pneg %p1031_p3  ;;  %p1038_p9 = por %p1037_p7, %p1036_p6 }
 0x13c   : > { %p1039_p10 = pnand %p1038_p9, %p1032_p5 }
 0x13e   : > { %1042 = shalt.err (!%p1039_p10)
}
 0x13f   : > { %s1043_s8 = scalar_lea.hbm %s719_s24, 128  ;;  %s1047_s14 = scalar_lea.hbm %s1523_s2, 256 }
 0x140   : > { %p1044_p11 = scmp.ne.s32.totalorder %s719_s24, %s1043_s8  ;;  %p1048_p0 = scmp.lt.u32.totalorder %s719_s24, %s1523_s2 }
 0x141   : > { %p1049_p1 = scmp.lt.u32.totalorder %s1047_s14, %s1043_s8  ;;  %p1051_p3 = scmp.lt.u32.totalorder %s1043_s8, %s719_s24 }
 0x142   : > { %p1045_p12 = pnand %p1044_p11, %p1217_p4 }
 0x143   : > { %p1050_p2 = por %p1049_p1, %p1048_p0 }
 0x144   : > { %p1046_p13 = pneg %p1045_p12 }
 0x145   : > { %p1052_p6 = por %p1051_p3, %p1050_p2 }
 0x147   : > { %p1053_p5 = pnand %p1052_p6, %p1046_p13 }
 0x149   : > { %1056 = shalt.err (!%p1053_p5)
}
 0x14a   : > { %924 = dma.vmem_to_hbm [thread:$0]  (%p1217_p4), %s1402_s29, 128, %s719_s24, %s695_s5  }
 0x14b   : > { %s237_s10 = scalar_lea.vmem [#allocation6], %s897_s13  ;;  %s1533_s7 = sshll.u32 %s1131_s18, 7 }
 0x14c   : > { %s751_s11 = sshll.u32 %s237_s10, 4  ;;  %s1472_s5 = scalar_lea.hbm %s1525_s4, %s1533_s7  ;;  %s1465_s11 = int_to_ptr.vmem [resolvable:$true] %s751_s11 }
 0x14d   : > { %s1057_s21 = scalar_lea.vmem %s1465_s11, 128  ;;  %s1149_s12 = smov [#allocation6]  }
 0x14e   : > { %p1058_p7 = scmp.ne.s32.totalorder %s1465_s11, %s1057_s21  ;;  %s1061_s13 = sshll.u32 %s1149_s12, 4  ;;  %s1062_s13 = int_to_ptr.vmem [resolvable:$false] %s1061_s13 }
 0x14f   : > { %s1063_s26 = scalar_lea.vmem %s1062_s13, 256  ;;  %p1064_p11 = scmp.lt.s32.totalorder %s1465_s11, %s1062_s13 }
 0x150   : > { %p1059_p9 = pnand %p1058_p7, %p1217_p4  ;;  %p1065_p12 = scmp.lt.s32.totalorder %s1063_s26, %s1057_s21 }
 0x152   : > { %p1060_p10 = pneg %p1059_p9  ;;  %p1066_p13 = por %p1065_p12, %p1064_p11 }
 0x154   : > { %p1067_p0 = pnand %p1066_p13, %p1060_p10 }
 0x1a6   : > { %v683_v14 = vpop.xlane.xlu1 %682 }
 0x1a7   : > { %v684_v42 = vrot.slane %v683_v14, 4 }
 0x1a9   : > { %v685_v43 = vadd.f32 %v684_v42, %v683_v14 }
 0x1ab   : > { %v686_v44 = vrot.slane %v685_v43, 2 }
 0x1ad   : > { %v687_v12 = vadd.f32 %v686_v44, %v685_v43 }
 0x1af   : > { %v688_v45 = vrot.slane %v687_v12, 1 }
 0x1b1   : > { %v689_v21 = vadd.f32 %v688_v45, %v687_v12 }
 0x1b3   : > { %922 = vpush %v689_v21 }
 0x1e4   : > { %s923_s6 = spop %922 }
 0x1e5   : > { %v691_v46 = vstv %s923_s6 }
 0x1e6   : > { %693 = vst [vmem:[%s237_s10] sm:$0xff] %v691_v46 }
 0x1e7   : > { %1070 = shalt.err (!%p1067_p0)
}
 0x1e8   : > { %s1071_s18 = scalar_lea.hbm %s1472_s5, 128  ;;  %s1075_s22 = scalar_lea.hbm %s1525_s4, 256 }
 0x1e9   : > { %p1072_p1 = scmp.ne.s32.totalorder %s1472_s5, %s1071_s18  ;;  %p1076_p6 = scmp.lt.u32.totalorder %s1472_s5, %s1525_s4 }
 0x1ea   : > { %p1077_p5 = scmp.lt.u32.totalorder %s1075_s22, %s1071_s18  ;;  %p1079_p9 = scmp.lt.u32.totalorder %s1071_s18, %s1472_s5 }
 0x1eb   : > { %p1073_p2 = pnand %p1072_p1, %p1217_p4 }
 0x1ec   : > { %p1078_p7 = por %p1077_p5, %p1076_p6 }
 0x1ed   : > { %p1074_p3 = pneg %p1073_p2 }
 0x1ee   : > { %p1080_p10 = por %p1079_p9, %p1078_p7 }
 0x1f0   : > { %p1081_p11 = pnand %p1080_p10, %p1074_p3 }
 0x1f2   : > { %1084 = shalt.err (!%p1081_p11)
}
 0x1f3   : > { %s1534_s6 = scalar_lea.sflag [#allocation5], %s1406_s30 }
 0x1f4   : > { %926 = dma.vmem_to_hbm [thread:$0]  (%p1217_p4), %s1465_s11, 128, %s1472_s5, %s1534_s6  }
 0x1f5 PF: > { %p940_p12 = scmp.ge.s32.totalorder %s1139_s20, 2  ;;  %s763_s7 = sand.u32 1, %s1119_s15  }
 0x1f6   : > { %s764_s29 = scalar_lea.sflag [#allocation3], %s763_s7 }
 0x1f7   : > { %p931_p13 = pnand %p940_p12, %p1226_p8 }
 0x1f9   : > { %1110 = dma.done.wait (!%p931_p13), %s764_s29, 128  }
 0x1fa   : > { %1112 = vsyncadd (!%p931_p13), %s764_s29, 4294967168  ;;  %s1535_s24 = sadd.s32 4294967294, %s1139_s20  }
 0x1fb   : > { %s772_s21 = sand.u32 1, %s1535_s24  }
 0x1fc   : > { %s773_s25 = scalar_lea.sflag [#allocation5], %s772_s21 }
 0x1fd   : > { %1114 = dma.done.wait (!%p931_p13), %s773_s25, 160  }
 0x1fe   : > { %1116 = vsyncadd (!%p931_p13), %s773_s25, 4294967136  ;;  %s21_s20 = sadd.s32 1, %s1139_s20   ;;  %s1536_s15 = smov %s1123_s16 }
 0x1ff   : > { %p18_p4 = scmp.ge.s32.totalorder %s21_s20, 4   ;;  %s1537_s16 = smov %s1127_s17 }
 0x200   : > { %s1538_s17 = smov %s1232_s28  ;;  %s1539_s18 = smov %s1135_s19 }
 0x201   : > { %s1540_s19 = smov %s1542_s23  ;;  %20 = sbr.rel (!%p18_p4) target bundleno = 6 (0x6), region = 98 }
 0x208   :  { %787 = vsyncpa [#allocation3], 1 }
 0x209   :  { %789 = vsyncpa [#allocation3 + $0x1], 1 }
 0x20a   :  { %790 = vsyncpa [#allocation5], 1 }
 0x20b   :  { %792 = vsyncpa [#allocation5 + $0x1], 1 }

</bundles_post_ra>
